<compile_context>
chip_gen: v7x
topology: tpu7x:2x2x1
jax: 0.10.0
libtpu: 0.0.40
codegen_flags: <defaults>
</compile_context>

<pallas_src>
import functools

import jax
import jax.numpy as jnp
from jax.experimental import pallas as pl
from jax.experimental.pallas import tpu as pltpu


def _round_up(x, m):
    return ((x + m - 1) // m) * m


# Conservative VMEM budget for tile selection (fits v5e/v6e/v7x with headroom for
# Mosaic internal scratch) and the hard cap we ever request from the compiler.
_VMEM_TILE_BUDGET = 28 * 1024 * 1024
_VMEM_LIMIT_CAP = 48 * 1024 * 1024


def _mlp_odr_kernel(x_ref, w1_ref, b1_ref, we_ref, be_ref, out_ref, h_acc):
    """grid = (batch tiles, K tiles); K (reduction over in_features) is last."""
    k = pl.program_id(1)

    @pl.when(k == 0)
    def _():
        h_acc[...] = jnp.zeros_like(h_acc)

    # Partial fc1 GEMM for this K slice.  x arrives at its native dtype and is cast
    # to bf16 on the VPU here (no separate XLA cast kernel / extra HBM round trip);
    # accumulation stays f32 in VMEM scratch.
    h_acc[...] += jnp.dot(x_ref[...].astype(jnp.bfloat16), w1_ref[...],
                          preferred_element_type=jnp.float32)

    @pl.when(k == pl.num_programs(1) - 1)
    def _():
        # TODO(synk): activation assumed ReLU (cusMLP source not provided).
        h = jnp.maximum(h_acc[...] + b1_ref[...], 0.0)            # (TB, hidden) f32
        # Fused encoder1||encoder2 GEMM against the packed lane-dense weight slab.
        out = jnp.dot(h.astype(we_ref.dtype), we_ref[...],
                      preferred_element_type=jnp.float32) + be_ref[...]
        out_ref[...] = out.astype(out_ref.dtype)                  # (TB, N_pad)


def _select_tiles(batch, in_features, hidden, n_pad, x_itemsize):
    """Pick (TB, TK) and report the VMEM footprint of the pipelined operands."""
    if batch <= 128:
        # Small batch: one grid step; TB a multiple of 16 (bf16 sublane packing of h).
        tb = _round_up(batch, 16)
    else:
        # Large batch: TB up to 512 to amortize per-grid-step overhead, but keep at
        # least 2 batch grid steps so the "parallel" axis feeds both v7x TensorCores.
        tb = max(128, min(512, _round_up((batch + 1) // 2, 128)))

    def footprint(tk, whole_k):
        return (2 * tb * tk * x_itemsize                      # x tiles (double-buffered)
                + (1 if whole_k else 2) * tk * hidden * 2     # w1 bf16 (resident / pipelined)
                + hidden * n_pad * 2                          # fused encoder weight (resident)
                + (hidden + n_pad) * 4                        # biases
                + tb * hidden * 4                             # f32 hidden accumulator scratch
                + 2 * tb * n_pad * 4)                         # output tiles (double-buffered)

    if footprint(in_features, True) <= _VMEM_TILE_BUDGET or in_features % 128 != 0:
        # Whole-K path: fc1 weight stays VMEM-resident across the batch grid.
        # TODO(synk): if in_features is not a multiple of 128 AND too big for the
        # budget we still take this path (K tiling would need zero-padded K blocks).
        return tb, in_features, footprint(in_features, True)

    # K-tiled path: largest multiple of 128 that divides in_features and fits.
    tk = in_features
    while tk > 128 and (in_features % tk != 0
                        or footprint(tk, False) > _VMEM_TILE_BUDGET):
        tk -= 128
    return tb, tk, footprint(tk, False)


def prepare_params(params, input_dim):
    """One-time (out,in)->(in,out) transpose, encoder fusion, lane padding, bf16 cast."""
    w1, b1, we1, be1, we2, be2 = params
    hidden, in_features = w1.shape
    assert we1.shape == (input_dim, hidden) and we2.shape == (input_dim, hidden)

    n_fused = 2 * input_dim
    n_pad = _round_up(n_fused, 128)                          # lane-dense output slab

    w1_t = jnp.transpose(w1).astype(jnp.bfloat16)            # (in_features, hidden)
    b1_r = b1.reshape(1, hidden).astype(jnp.float32)

    we_packed = jnp.concatenate(
        [jnp.transpose(we1), jnp.transpose(we2)], axis=1)    # (hidden, 2*input_dim)
    be_packed = jnp.concatenate([be1, be2], axis=0).reshape(1, n_fused)

    we_p = jnp.zeros((hidden, n_pad), jnp.bfloat16)
    we_p = we_p.at[:, :n_fused].set(we_packed.astype(jnp.bfloat16))
    be_p = jnp.zeros((1, n_pad), jnp.float32)
    be_p = be_p.at[:, :n_fused].set(be_packed.astype(jnp.float32))
    return w1_t, b1_r, we_p, be_p


@functools.partial(jax.jit, static_argnames=("input_dim",))
def cus_mlp_odr_forward(x, prepared, *, input_dim):
    """x: (B, C, H, W), any float dtype.  Returns (x1, x2), each (B, input_dim) f32."""
    w1_t, b1_r, we_p, be_p = prepared
    in_features, hidden = w1_t.shape
    n_pad = we_p.shape[1]

    batch = x.shape[0]
    x_flat = x.reshape(batch, -1)            # free bitcast; NO wrapper-side cast/pad
    assert x_flat.shape[1] == in_features

    tb, tk, fp = _select_tiles(batch, in_features, hidden, n_pad,
                               x_flat.dtype.itemsize)
    grid = (pl.cdiv(batch, tb), in_features // tk)

    # Explicit scoped-VMEM limit sized from the chosen tiles, clamped for v7x.
    vmem_limit = int(min(_VMEM_LIMIT_CAP, max(32 * 1024 * 1024, fp + (8 << 20))))

    flops = 2 * batch * in_features * hidden + 2 * batch * hidden * n_pad
    bytes_accessed = (x_flat.size * x_flat.dtype.itemsize + w1_t.size * 2
                      + we_p.size * 2 + b1_r.size * 4 + be_p.size * 4
                      + batch * n_pad * 4)

    out = pl.pallas_call(
        _mlp_odr_kernel,
        out_shape=jax.ShapeDtypeStruct((batch, n_pad), jnp.float32),
        grid=grid,
        in_specs=[
            pl.BlockSpec((tb, tk), lambda i, k: (i, k)),          # x tile
            pl.BlockSpec((tk, hidden), lambda i, k: (k, 0)),      # w1 K-slice
            pl.BlockSpec((1, hidden), lambda i, k: (0, 0)),       # b1 (resident)
            pl.BlockSpec((hidden, n_pad), lambda i, k: (0, 0)),   # fused enc weight
            pl.BlockSpec((1, n_pad), lambda i, k: (0, 0)),        # fused enc bias
        ],
        out_specs=pl.BlockSpec((tb, n_pad), lambda i, k: (i, 0)),
        scratch_shapes=[pltpu.VMEM((tb, hidden), jnp.float32)],   # fc1 accumulator
        compiler_params=pltpu.CompilerParams(
            dimension_semantics=("parallel", "arbitrary"),
            vmem_limit_bytes=vmem_limit),
        cost_estimate=pl.CostEstimate(
            flops=flops, transcendentals=0, bytes_accessed=bytes_accessed),
    )(x_flat, w1_t, b1_r, we_p, be_p)

    # Single contiguous slice of the lane-padded slab, then split into x1/x2.
    fused = out[:, :2 * input_dim]
    return fused[:, :input_dim], fused[:, input_dim:]


def init_params(key, input_dim, in_features, hidden_features):
    """Deterministic PyTorch-style (uniform +-1/sqrt(fan_in)) init, f32 (out,in)."""
    ks = jax.random.split(key, 6)

    def lin(kw, kb, fan_in, fan_out):
        bound = 1.0 / jnp.sqrt(fan_in)
        w = jax.random.uniform(kw, (fan_out, fan_in), jnp.float32, -bound, bound)
        b = jax.random.uniform(kb, (fan_out,), jnp.float32, -bound, bound)
        return w, b

    w1, b1 = lin(ks[0], ks[1], in_features, hidden_features)      # backbone fc1
    we1, be1 = lin(ks[2], ks[3], hidden_features, input_dim)      # encoder1_net
    we2, be2 = lin(ks[4], ks[5], hidden_features, input_dim)      # encoder2_net
    return (w1, b1, we1, be1, we2, be2)


def reference_forward(x, params):
    """Pure-JAX f32 reference matching the PyTorch module."""
    w1, b1, we1, be1, we2, be2 = params
    xf = x.reshape(x.shape[0], -1)
    h = jnp.maximum(xf @ w1.T + b1, 0.0)
    return h @ we1.T + be1, h @ we2.T + be2


if __name__ == "__main__":
    # Small shapes: batch=2, channels=4, spatial=16x16 -> in_features=1024.
    B, C, H, W = 2, 4, 16, 16
    in_features = C * H * W            # 1024
    hidden_features = 128
    input_dim = 32

    key = jax.random.PRNGKey(0)
    kx, kp = jax.random.split(key)
    x = jax.random.normal(kx, (B, C, H, W), dtype=jnp.float32)
    params = init_params(kp, input_dim, in_features, hidden_features)

    prepared = prepare_params(params, input_dim)   # one-time packing/transpose/bf16
    x1, x2 = cus_mlp_odr_forward(x, prepared, input_dim=input_dim)
    jax.block_until_ready((x1, x2))

    r1, r2 = reference_forward(x, params)
    assert x1.shape == (B, input_dim) and x2.shape == (B, input_dim)
    # bf16 MXU operands vs f32 reference -> loosened tolerance (accumulation is f32).
    assert jnp.allclose(x1, r1, atol=3e-2, rtol=3e-2)
    assert jnp.allclose(x2, r2, atol=3e-2, rtol=3e-2)
    print("KERNEL_OK")
</pallas_src>

<mosaic_0001>
module attributes {stable_mosaic.version = 11 : i64} {
  func.func @_mlp_odr_kernel(%arg0: i32, %arg1: i32, %arg2: memref<16x1024xf32, #tpu.memory_space<vmem>>, %arg3: memref<1024x128xbf16, #tpu.memory_space<vmem>>, %arg4: memref<1x128xf32, #tpu.memory_space<vmem>>, %arg5: memref<128x128xbf16, #tpu.memory_space<vmem>>, %arg6: memref<1x128xf32, #tpu.memory_space<vmem>>, %arg7: memref<16x128xf32, #tpu.memory_space<vmem>>, %arg8: memref<16x128xf32, #tpu.memory_space<vmem>>) attributes {dimension_semantics = [#tpu.dimension_semantics<parallel>, #tpu.dimension_semantics<arbitrary>], iteration_bounds = array<i64: 1, 1>, scalar_prefetch = 0 : i64, scratch_operands = 1 : i64, tpu.core_type = #tpu.core_type<tc>, window_params = [{transform_indices = @transform_0, window_bounds = array<i64: 16, 1024>}, {transform_indices = @transform_1, window_bounds = array<i64: 1024, 128>}, {pipeline_mode = #tpu.pipeline_mode<synchronous>, transform_indices = @transform_2, window_bounds = array<i64: 1, 128>}, {pipeline_mode = #tpu.pipeline_mode<synchronous>, transform_indices = @transform_3, window_bounds = array<i64: 128, 128>}, {pipeline_mode = #tpu.pipeline_mode<synchronous>, transform_indices = @transform_4, window_bounds = array<i64: 1, 128>}, {transform_indices = @transform_5, window_bounds = array<i64: 16, 128>}]} {
    %c0_i32 = arith.constant 0 : i32
    %0 = arith.cmpi eq, %arg1, %c0_i32 : i32
    %1 = arith.extui %0 : i1 to i32
    %c0_i32_0 = arith.constant 0 : i32
    %2 = arith.cmpi ne, %1, %c0_i32_0 : i32
    scf.if %2 {
      %cst_10 = arith.constant 0.000000e+00 : f32
      %13 = vector.broadcast %cst_10 : f32 to vector<16x128xf32>
      %c0_11 = arith.constant 0 : index
      %c0_12 = arith.constant 0 : index
      %14 = vector.load %arg8[%c0_11, %c0_12] : memref<16x128xf32, #tpu.memory_space<vmem>>, vector<16x128xf32>
      tpu.vector_store %arg8[%c0_11, %c0_12], %13 {strides = array<i32>} : memref<16x128xf32, #tpu.memory_space<vmem>>, vector<16x128xf32>,
    } else {
    }
    %c0 = arith.constant 0 : index
    %c0_1 = arith.constant 0 : index
    %3 = vector.load %arg8[%c0, %c0_1] : memref<16x128xf32, #tpu.memory_space<vmem>>, vector<16x128xf32>
    %c0_2 = arith.constant 0 : index
    %c0_3 = arith.constant 0 : index
    %4 = vector.load %arg2[%c0_2, %c0_3] : memref<16x1024xf32, #tpu.memory_space<vmem>>, vector<16x1024xf32>
    %5 = arith.truncf %4 : vector<16x1024xf32> to vector<16x1024xbf16>
    %c0_4 = arith.constant 0 : index
    %c0_5 = arith.constant 0 : index
    %6 = vector.load %arg3[%c0_4, %c0_5] : memref<1024x128xbf16, #tpu.memory_space<vmem>>, vector<1024x128xbf16>
    %cst = arith.constant dense<0.000000e+00> : vector<16x128xf32>
    %7 = tpu.matmul %5, %6, %cst {dimension_numbers = #tpu.dot_dimension_numbers<[1], [0], [0], [1], [0, 0, 1, 1], [], []>} : vector<16x1024xbf16>, vector<1024x128xbf16>, vector<16x128xf32> -> vector<16x128xf32>
    %8 = arith.addf %3, %7 : vector<16x128xf32>
    %c0_6 = arith.constant 0 : index
    %c0_7 = arith.constant 0 : index
    %9 = vector.load %arg8[%c0_6, %c0_7] : memref<16x128xf32, #tpu.memory_space<vmem>>, vector<16x128xf32>
    tpu.vector_store %arg8[%c0_6, %c0_7], %8 {strides = array<i32>} : memref<16x128xf32, #tpu.memory_space<vmem>>, vector<16x128xf32>,
    %c0_i32_8 = arith.constant 0 : i32
    %10 = arith.cmpi eq, %arg1, %c0_i32_8 : i32
    %11 = arith.extui %10 : i1 to i32
    %c0_i32_9 = arith.constant 0 : i32
    %12 = arith.cmpi ne, %11, %c0_i32_9 : i32
    scf.if %12 {
      %c0_10 = arith.constant 0 : index
      %c0_11 = arith.constant 0 : index
      %13 = vector.load %arg8[%c0_10, %c0_11] : memref<16x128xf32, #tpu.memory_space<vmem>>, vector<16x128xf32>
      %c0_12 = arith.constant 0 : index
      %c0_13 = arith.constant 0 : index
      %14 = vector.load %arg4[%c0_12, %c0_13] : memref<1x128xf32, #tpu.memory_space<vmem>>, vector<1x128xf32>
      %15 = vector.broadcast %14 : vector<1x128xf32> to vector<16x128xf32>
      %16 = arith.addf %13, %15 : vector<16x128xf32>
      %cst_14 = arith.constant 0.000000e+00 : f32
      %17 = vector.broadcast %cst_14 : f32 to vector<16x128xf32>
      %18 = arith.maximumf %16, %17 : vector<16x128xf32>
      %19 = arith.truncf %18 : vector<16x128xf32> to vector<16x128xbf16>
      %c0_15 = arith.constant 0 : index
      %c0_16 = arith.constant 0 : index
      %20 = vector.load %arg5[%c0_15, %c0_16] : memref<128x128xbf16, #tpu.memory_space<vmem>>, vector<128x128xbf16>
      %cst_17 = arith.constant dense<0.000000e+00> : vector<16x128xf32>
      %21 = tpu.matmul %19, %20, %cst_17 {dimension_numbers = #tpu.dot_dimension_numbers<[1], [0], [0], [1], [0, 0, 1, 1], [], []>} : vector<16x128xbf16>, vector<128x128xbf16>, vector<16x128xf32> -> vector<16x128xf32>
      %c0_18 = arith.constant 0 : index
      %c0_19 = arith.constant 0 : index
      %22 = vector.load %arg6[%c0_18, %c0_19] : memref<1x128xf32, #tpu.memory_space<vmem>>, vector<1x128xf32>
      %23 = vector.broadcast %22 : vector<1x128xf32> to vector<16x128xf32>
      %24 = arith.addf %21, %23 : vector<16x128xf32>
      %c0_20 = arith.constant 0 : index
      %c0_21 = arith.constant 0 : index
      %25 = vector.load %arg7[%c0_20, %c0_21] : memref<16x128xf32, #tpu.memory_space<vmem>>, vector<16x128xf32>
      tpu.vector_store %arg7[%c0_20, %c0_21], %24 {strides = array<i32>} : memref<16x128xf32, #tpu.memory_space<vmem>>, vector<16x128xf32>,
    } else {
    }
    return
  }
  func.func @transform_0(%arg0: i32, %arg1: i32) -> (i32, i32) {
    %c0_i32 = arith.constant 0 : i32
    return %arg0, %arg1 : i32, i32
  }
  func.func @transform_1(%arg0: i32, %arg1: i32) -> (i32, i32) {
    %c0_i32 = arith.constant 0 : i32
    %c0_i32_0 = arith.constant 0 : i32
    return %arg1, %c0_i32 : i32, i32
  }
  func.func @transform_2(%arg0: i32, %arg1: i32) -> (i32, i32) {
    %c0_i32 = arith.constant 0 : i32
    %c0_i32_0 = arith.constant 0 : i32
    %c0_i32_1 = arith.constant 0 : i32
    return %c0_i32, %c0_i32_0 : i32, i32
  }
  func.func @transform_3(%arg0: i32, %arg1: i32) -> (i32, i32) {
    %c0_i32 = arith.constant 0 : i32
    %c0_i32_0 = arith.constant 0 : i32
    %c0_i32_1 = arith.constant 0 : i32
    return %c0_i32, %c0_i32_0 : i32, i32
  }
  func.func @transform_4(%arg0: i32, %arg1: i32) -> (i32, i32) {
    %c0_i32 = arith.constant 0 : i32
    %c0_i32_0 = arith.constant 0 : i32
    %c0_i32_1 = arith.constant 0 : i32
    return %c0_i32, %c0_i32_0 : i32, i32
  }
  func.func @transform_5(%arg0: i32, %arg1: i32) -> (i32, i32) {
    %c0_i32 = arith.constant 0 : i32
    %c0_i32_0 = arith.constant 0 : i32
    return %arg0, %c0_i32 : i32, i32
  }
}

</mosaic_0001>

<bundles_post_ra>
// kernel: cus_mlp_odr_forward.1
= control target key start
LH: loop header
LB: loop body
LE: loop exit
PB: predicated region body
PF: predicated region fallthrough
CT: control target
= control target key end

     0   :  { %10 = vsyncpa [#allocation4], 0  ;;  %s1411_s18 = smov [#allocation3]   ;;  %s1558_s0 = inlined_call_operand.vmem [shape: f32[2,1024], index: 0, kind: input, shape index: {}]   ;;  %s1559_s1 = inlined_call_operand.hbm [shape: bf16[1024,128], index: 1, kind: input, shape index: {}]   ;;  %s1560_s2 = inlined_call_operand.vmem [shape: f32[1,128], index: 2, kind: input, shape index: {}]   ;;  %s1561_s3 = inlined_call_operand.vmem [shape: bf16[128,128], index: 3, kind: input, shape index: {}]   ;;  %s1562_s4 = inlined_call_operand.vmem [shape: f32[1,128], index: 4, kind: input, shape index: {}]   ;;  %s1563_s5 = inlined_call_operand.vmem [shape: f32[2,128], index: 5, kind: output, shape index: {}]  }
   0x1   :  { %s18_s19 = sshll.u32 %s1411_s18, 4  ;;  %s1387_s22 = scalar_lea.hbm %s1559_s1, 8192  ;;  %s19_s19 = int_to_ptr.vmem [resolvable:$true] %s18_s19 }
   0x2   :  { %p1388_p0 = scmp.ne.s32.totalorder %s1559_s1, %s1387_s22  ;;  %p1391_p1 = scmp.lt.u32.totalorder %s1387_s22, %s1559_s1 }
   0x4   :  { %p1393_p2 = pnand %p1391_p1, %p1388_p0 }
   0x6   :  { %1396 = shalt.err (!%p1393_p2)
}
   0x7   :  { %s1397_s27 = scalar_lea.vmem %s19_s19, 8192  ;;  %p1402_p4 = scmp.lt.s32.totalorder %s19_s19, %s19_s19 }
   0x8   :  { %p1398_p3 = scmp.ne.s32.totalorder %s19_s19, %s1397_s27  ;;  %p1403_p5 = scmp.lt.s32.totalorder %s1397_s27, %s1397_s27 }
   0xa   :  { %p1404_p6 = por %p1403_p5, %p1402_p4 }
   0xc   :  { %p1405_p7 = pnand %p1404_p6, %p1398_p3 }
   0xe   :  { %1408 = shalt.err (!%p1405_p7)
}
   0xf   :  { %s1412_s28 = smov 64   ;;  %s1413_s29 = smov 4  }
  0x10   :  { %24 = dma.hbm_to_vmem [thread:$0]  %s1559_s1, 8192, %s19_s19, [#allocation4], %s1412_s28, %s1412_s28, %s1413_s29  }
  0x11   :  { %1409 = dma.done.wait [#allocation4], 8192  }
  0x12   :  { %1410 = vsyncadd [#allocation4], 4294959104  ;;  %v1291_v0 = vld [vmem:[#allocation3 + $0x40] sm:$0xff]   ;;  %v1295_v4 = vld [vmem:[#allocation3 + $0x48] sm:$0xff]   ;;  %v1414_v25 = vmov 1983009808   ;;  %v82_v27 = vlaneseq }
  0x13   :  { %v1292_v1 = vld [vmem:[#allocation3 + $0xc0] sm:$0xff]   ;;  %1168 = vmatprep.subr.bf16.mxu0 %v1291_v0  ;;  %v1296_v5 = vld [vmem:[#allocation3 + $0xc8] sm:$0xff]   ;;  %v1299_v8 = vld [vmem:[#allocation3 + $0x50] sm:$0xff]   ;;  %v80_v26 = vunpack.c.l.s4 %v1414_v25  ;;  %vm1416_vm0 = vmmov 0  }
  0x14   :  { %v1293_v2 = vld [vmem:[#allocation3] sm:$0xff]   ;;  %1190 = vmatprep.subr.bf16.mxu1 %v1292_v1  ;;  %v1297_v6 = vld [vmem:[#allocation3 + $0x8] sm:$0xff]   ;;  %v1300_v9 = vld [vmem:[#allocation3 + $0xd0] sm:$0xff]   ;;  %v83_v33 = vshrl.u32 %v82_v27, 7 }
  0x15   :  { %v1294_v3 = vld [vmem:[#allocation3 + $0x80] sm:$0xff]   ;;  %1169 = vmatpush3.bf16.msra.mxu0 %v1293_v2  ;;  %v1298_v7 = vld [vmem:[#allocation3 + $0x88] sm:$0xff]   ;;  %v1301_v10 = vld [vmem:[#allocation3 + $0x10] sm:$0xff]   ;;  %v81_v32 = vunpack.c.0.s8 %v80_v26 }
  0x16   :  { %1191 = vmatpush3.bf16.msra.mxu1 %v1294_v3  ;;  %1170 = vmatprep.subr.bf16.mxu0 %v1295_v4  ;;  %v1302_v11 = vld [vmem:[#allocation3 + $0x90] sm:$0xff]   ;;  %v1303_v12 = vld [vmem:[#allocation3 + $0x58] sm:$0xff]   ;;  %v1307_v16 = vld [vmem:[#allocation3 + $0x60] sm:$0xff]  }
  0x17   :  { %1192 = vmatprep.subr.bf16.mxu1 %v1296_v5  ;;  %v1304_v13 = vld [vmem:[#allocation3 + $0xd8] sm:$0xff]   ;;  %v1308_v17 = vld [vmem:[#allocation3 + $0xe0] sm:$0xff]   ;;  %v1311_v20 = vld [vmem:[#allocation3 + $0x68] sm:$0xff]   ;;  %v1459_v37 = vsub.s32 %v81_v32, %v83_v33 }
  0x18   :  { %v1305_v14 = vld [vmem:[#allocation3 + $0x18] sm:$0xff]   ;;  %v1309_v18 = vld [vmem:[#allocation3 + $0x20] sm:$0xff]   ;;  %v1312_v21 = vld [vmem:[#allocation3 + $0xe8] sm:$0xff]  }
  0x19   :  { %1171 = vmatpush3.bf16.msra.mxu0 %v1297_v6  ;;  %v1306_v15 = vld [vmem:[#allocation3 + $0x98] sm:$0xff]   ;;  %v1310_v19 = vld [vmem:[#allocation3 + $0xa0] sm:$0xff]   ;;  %v1313_v22 = vld [vmem:[#allocation3 + $0x28] sm:$0xff]  }
  0x1a   :  { %1193 = vmatpush3.bf16.msra.mxu1 %v1298_v7  ;;  %1172 = vmatprep.subr.bf16.mxu0 %v1299_v8  ;;  %v1314_v23 = vld [vmem:[#allocation3 + $0xa8] sm:$0xff]   ;;  %v1315_v24 = vld [vmem:[#allocation3 + $0x70] sm:$0xff]   ;;  %v1319_v31 = vld [vmem:[#allocation3 + $0x78] sm:$0xff]  }
  0x1b   :  { %1194 = vmatprep.subr.bf16.mxu1 %v1300_v9  ;;  %v1316_v28 = vld [vmem:[#allocation3 + $0xf0] sm:$0xff]   ;;  %v1320_v34 = vld [vmem:[#allocation3 + $0xf8] sm:$0xff]   ;;  %v1335_v53 = vld [vmem:[#allocation3 + $0x140] sm:$0xff]  }
  0x1c   :  { %v1317_v29 = vld [vmem:[#allocation3 + $0x30] sm:$0xff]   ;;  %v1321_v35 = vld [vmem:[#allocation3 + $0x38] sm:$0xff]   ;;  %v1336_v58 = vld [vmem:[#allocation3 + $0x1c0] sm:$0xff]  }
  0x1d   :  { %1173 = vmatpush3.bf16.msra.mxu0 %v1301_v10  ;;  %v1318_v30 = vld [vmem:[#allocation3 + $0xb0] sm:$0xff]   ;;  %v1322_v36 = vld [vmem:[#allocation3 + $0xb8] sm:$0xff]   ;;  %v1337_v62 = vld [vmem:[#allocation3 + $0x100] sm:$0xff]  }
  0x1e   :  { %1195 = vmatpush3.bf16.msra.mxu1 %v1302_v11  ;;  %1174 = vmatprep.subr.bf16.mxu0 %v1303_v12  ;;  %v1323_v38 = vld [vmem:[%s1558_s0] ss:$16 sps:$4 sm:$0xff]   ;;  %v1331_v43 = vld [vmem:[%s1558_s0 + $0x4] ss:$16 sps:$4 sm:$0xff]   ;;  %v1339_v4 = vld [vmem:[#allocation3 + $0x148] sm:$0xff]  }
  0x1f   :  { %1196 = vmatprep.subr.bf16.mxu1 %v1304_v13  ;;  %v1325_v39 = vld [vmem:[%s1558_s0 + $0x20] ss:$16 sps:$4 sm:$0xff]   ;;  %v85_v42 = vrot.slane %v1323_v38, %v1459_v37  ;;  %v1332_v44 = vld [vmem:[%s1558_s0 + $0x24] ss:$16 sps:$4 sm:$0xff]   ;;  %v92_v50 = vrot.slane %v1331_v43, %v1459_v37  ;;  %v1340_v7 = vld [vmem:[#allocation3 + $0x1c8] sm:$0xff]  }
  0x20   :  { %v1327_v40 = vld [vmem:[%s1558_s0 + $0x40] ss:$16 sps:$4 sm:$0xff]   ;;  %v1333_v45 = vld [vmem:[%s1558_s0 + $0x44] ss:$16 sps:$4 sm:$0xff]   ;;  %v99_v46 = vrot.slane %v1325_v39, %v1459_v37  ;;  %v106_v51 = vrot.slane %v1332_v44, %v1459_v37  ;;  %v1341_v8 = vld [vmem:[#allocation3 + $0x108] sm:$0xff]  }
  0x21   :  { %1175 = vmatpush3.bf16.msra.mxu0 %v1305_v14  ;;  %v1329_v41 = vld [vmem:[%s1558_s0 + $0x60] ss:$16 sps:$4 sm:$0xff]   ;;  %v157_v47 = vrot.slane %v1327_v40, %v1459_v37  ;;  %v1334_v49 = vld [vmem:[%s1558_s0 + $0x64] ss:$16 sps:$4 sm:$0xff]   ;;  %v164_v52 = vrot.slane %v1333_v45, %v1459_v37  ;;  %v1342_v9 = vld [vmem:[#allocation3 + $0x188] sm:$0xff]  }
  0x22   :  { %1197 = vmatpush3.bf16.msra.mxu1 %v1306_v15  ;;  %1176 = vmatprep.subr.bf16.mxu0 %v1307_v16  ;;  %v171_v48 = vrot.slane %v1329_v41, %v1459_v37  ;;  %v108_v54 = vcombine.high %v85_v42, %v99_v46  ;;  %v178_v56 = vrot.slane %v1334_v49, %v1459_v37  ;;  %v1338_v2 = vld [vmem:[#allocation3 + $0x180] sm:$0xff]   ;;  %v1343_v10 = vld [vmem:[#allocation3 + $0x150] sm:$0xff]   ;;  %v1347_v14 = vld [vmem:[#allocation3 + $0x158] sm:$0xff]  }
  0x23   :  { %1198 = vmatprep.subr.bf16.mxu1 %v1308_v17  ;;  %v107_v57 = vcombine.low %v85_v42, %v99_v46  ;;  %v110_v59 = vcombine.high %v92_v50, %v106_v51  ;;  %v109_v61 = vcombine.low %v92_v50, %v106_v51  ;;  %v1344_v11 = vld [vmem:[#allocation3 + $0x1d0] sm:$0xff]   ;;  %v1348_v15 = vld [vmem:[#allocation3 + $0x1d8] sm:$0xff]   ;;  %v1358_v25 = vld [vmem:[#allocation3 + $0x1a8] sm:$0xff]  }
  0x24   :  { %v180_v55 = vcombine.high %v157_v47, %v171_v48  ;;  %v179_v60 = vcombine.low %v157_v47, %v171_v48  ;;  %v182_v0 = vcombine.high %v164_v52, %v178_v56  ;;  %v181_v1 = vcombine.low %v164_v52, %v178_v56  ;;  %v1345_v12 = vld [vmem:[#allocation3 + $0x110] sm:$0xff]   ;;  %v1349_v16 = vld [vmem:[#allocation3 + $0x118] sm:$0xff]  }
  0x25   :  { %1177 = vmatpush3.bf16.msra.mxu0 %v1309_v18  ;;  %v1346_v13 = vld [vmem:[#allocation3 + $0x190] sm:$0xff]   ;;  %v1350_v17 = vld [vmem:[#allocation3 + $0x198] sm:$0xff]   ;;  %v1351_v18 = vld [vmem:[#allocation3 + $0x160] sm:$0xff]  }
  0x26   :  { %1199 = vmatpush3.bf16.msra.mxu1 %v1310_v19  ;;  %1178 = vmatprep.subr.bf16.mxu0 %v1311_v20  ;;  %v236_v63 = vpack.c.bf16 %v180_v55, %v108_v54  ;;  %v235_v3 = vpack.c.bf16 %v179_v60, %v107_v57  ;;  %v238_v5 = vpack.c.bf16 %v182_v0, %v110_v59  ;;  %v1352_v19 = vld [vmem:[#allocation3 + $0x1e0] sm:$0xff]   ;;  %v1359_v26 = vld [vmem:[#allocation3 + $0x170] sm:$0xff]   ;;  %v1365_v32 = vld [vmem:[#allocation3 + $0x138] sm:$0xff]  }
  0x27   :  { %1200 = vmatprep.subr.bf16.mxu1 %v1312_v21  ;;  %v237_v6 = vpack.c.bf16 %v181_v1, %v109_v61  ;;  %v1353_v20 = vld [vmem:[#allocation3 + $0x120] sm:$0xff]   ;;  %v1360_v27 = vld [vmem:[#allocation3 + $0x1f0] sm:$0xff]   ;;  %v1366_v33 = vld [vmem:[#allocation3 + $0x1b8] sm:$0xff]  }
  0x28   :  { %787 = vmatprep.mubr.bf16.mxu0 %v236_v63  ;;  %828 = vmatprep.mubr.bf16.mxu1 %v238_v5  ;;  %v1354_v21 = vld [vmem:[#allocation3 + $0x1a0] sm:$0xff]   ;;  %v1373_v38 = vld [vmem:[%s1558_s0 + $0x68] ss:$16 sps:$4 sm:$0xff]   ;;  %v1375_v39 = vld [vmem:[%s1558_s0 + $0xc] ss:$16 sps:$4 sm:$0xff]  }
  0x29   :  { %1179 = vmatpush3.bf16.msra.mxu0 %v1313_v22  ;;  %v1355_v22 = vld [vmem:[#allocation3 + $0x168] sm:$0xff]   ;;  %v207_v46 = vrot.slane %v1373_v38, %v1459_v37  ;;  %v128_v47 = vrot.slane %v1375_v39, %v1459_v37  ;;  %v1379_v63 = vld [vmem:[%s1561_s3] sm:$0xff]   ;;  %v1381_v1 = vld [vmem:[%s1561_s3 + $0x10] sm:$0xff]  }
  0x2a   :  { %1201 = vmatpush3.bf16.msra.mxu1 %v1314_v23  ;;  %1180 = vmatprep.subr.bf16.mxu0 %v1315_v24  ;;  %v1356_v23 = vld [vmem:[#allocation3 + $0x1e8] sm:$0xff]   ;;  %v1385_v5 = vld [vmem:[%s1561_s3 + $0x30] sm:$0xff]  }
  0x2b   :  { %1202 = vmatprep.subr.bf16.mxu1 %v1316_v28  ;;  %v1357_v24 = vld [vmem:[#allocation3 + $0x128] sm:$0xff]   ;;  %v1361_v28 = vld [vmem:[#allocation3 + $0x130] sm:$0xff]  }
  0x2c   :  { %v1376_v40 = vld [vmem:[%s1558_s0 + $0x2c] ss:$16 sps:$4 sm:$0xff]  }
  0x2d   :  { %1181 = vmatpush3.bf16.msra.mxu0 %v1317_v29  ;;  %v1362_v29 = vld [vmem:[#allocation3 + $0x1b0] sm:$0xff]   ;;  %v1377_v44 = vld [vmem:[%s1558_s0 + $0x4c] ss:$16 sps:$4 sm:$0xff]   ;;  %v142_v48 = vrot.slane %v1376_v40, %v1459_v37 }
  0x2e   :  { %1203 = vmatpush3.bf16.msra.mxu1 %v1318_v30  ;;  %1182 = vmatprep.subr.bf16.mxu0 %v1319_v31  ;;  %v1363_v30 = vld [vmem:[#allocation3 + $0x178] sm:$0xff]   ;;  %v200_v50 = vrot.slane %v1377_v44, %v1459_v37  ;;  %v1380_v0 = vld [vmem:[%s1561_s3 + $0x8] sm:$0xff]   ;;  %v1159_v44 = vld [vmem:[%s1562_s4] ss:$0 sm:$0xff] }
  0x2f   :  { %1204 = vmatprep.subr.bf16.mxu1 %v1320_v34  ;;  %v1364_v31 = vld [vmem:[#allocation3 + $0x1f8] sm:$0xff]   ;;  %v146_v54 = vcombine.high %v128_v47, %v142_v48  ;;  %v145_v56 = vcombine.low %v128_v47, %v142_v48 }
  0x30   :  { %v1367_v34 = vld [vmem:[%s1558_s0 + $0x8] ss:$16 sps:$4 sm:$0xff]   ;;  %v1378_v45 = vld [vmem:[%s1558_s0 + $0x6c] ss:$16 sps:$4 sm:$0xff]  }
  0x31   :  { %1183 = vmatpush3.bf16.msra.mxu0 %v1321_v35  ;;  %v1369_v35 = vld [vmem:[%s1558_s0 + $0x28] ss:$16 sps:$4 sm:$0xff]   ;;  %v121_v41 = vrot.slane %v1367_v34, %v1459_v37  ;;  %v214_v51 = vrot.slane %v1378_v45, %v1459_v37 }
  0x32   :  { %1205 = vmatpush3.bf16.msra.mxu1 %v1322_v36  ;;  %1212 = vmatprep.subr.bf16.mxu0 %v1335_v53  ;;  %v1371_v36 = vld [vmem:[%s1558_s0 + $0x48] ss:$16 sps:$4 sm:$0xff]   ;;  %v135_v42 = vrot.slane %v1369_v35, %v1459_v37 }
  0x33   :  { %1234 = vmatprep.subr.bf16.mxu1 %v1336_v58  ;;  %v193_v43 = vrot.slane %v1371_v36, %v1459_v37  ;;  %v218_v57 = vcombine.high %v200_v50, %v214_v51  ;;  %v217_v58 = vcombine.low %v200_v50, %v214_v51  ;;  %v1415_v37 = vmov 0.0  }
  0x34   :  { %788 = vmatmul.mubr.bf16.vlgmr.msra.gmra.mrb[0].mxu0 %v235_v3  ;;  %v144_v49 = vcombine.high %v121_v41, %v135_v42  ;;  %v143_v52 = vcombine.low %v121_v41, %v135_v42  ;;  %v1383_v3 = vld [vmem:[%s1561_s3 + $0x20] sm:$0xff]  }
  0x35   :  { %1213 = vmatpush3.bf16.msra.mxu0 %v1337_v62  ;;  %829 = vmatmul.mubr.bf16.vlgmr.msra.gmra.mrb[0].mxu1 %v237_v6  ;;  %v216_v53 = vcombine.high %v193_v43, %v207_v46  ;;  %v215_v55 = vcombine.low %v193_v43, %v207_v46  ;;  %v242_v61 = vpack.c.bf16 %v218_v57, %v146_v54  ;;  %v1386_v6 = vld [vmem:[%s1561_s3 + $0x38] sm:$0xff]  }
  0x36   :  { %1214 = vmatprep.subr.bf16.mxu0 %v1339_v4  ;;  %1235 = vmatpush3.bf16.msra.mxu1 %v1338_v2  ;;  %v241_v62 = vpack.c.bf16 %v217_v58, %v145_v56  ;;  %v1382_v2 = vld [vmem:[%s1561_s3 + $0x18] sm:$0xff]   ;;  %v1384_v4 = vld [vmem:[%s1561_s3 + $0x28] sm:$0xff]  }
  0x37   :  { %1236 = vmatprep.subr.bf16.mxu1 %v1340_v7  ;;  %v240_v59 = vpack.c.bf16 %v216_v53, %v144_v49  ;;  %v239_v60 = vpack.c.bf16 %v215_v55, %v143_v52  ;;  %910 = vmatprep.mubr.bf16.mxu1 %v242_v61 }
  0x39   :  { %1215 = vmatpush3.bf16.msra.mxu0 %v1341_v8  ;;  %869 = vmatprep.mubr.bf16.mxu0 %v240_v59 }
  0x3a   :  { %1216 = vmatprep.subr.bf16.mxu0 %v1343_v10  ;;  %1237 = vmatpush3.bf16.msra.mxu1 %v1342_v9 }
  0x3b   :  { %1238 = vmatprep.subr.bf16.mxu1 %v1344_v11 }
  0x3d   :  { %1217 = vmatpush3.bf16.msra.mxu0 %v1345_v12 }
  0x3e   :  { %1218 = vmatprep.subr.bf16.mxu0 %v1347_v14  ;;  %1239 = vmatpush3.bf16.msra.mxu1 %v1346_v13 }
  0x3f   :  { %1240 = vmatprep.subr.bf16.mxu1 %v1348_v15 }
  0x41   :  { %1219 = vmatpush3.bf16.msra.mxu0 %v1349_v16 }
  0x42   :  { %1220 = vmatprep.subr.bf16.mxu0 %v1351_v18  ;;  %1241 = vmatpush3.bf16.msra.mxu1 %v1350_v17 }
  0x43   :  { %1242 = vmatprep.subr.bf16.mxu1 %v1352_v19 }
  0x45   :  { %1221 = vmatpush3.bf16.msra.mxu0 %v1353_v20 }
  0x46   :  { %1222 = vmatprep.subr.bf16.mxu0 %v1355_v22  ;;  %1243 = vmatpush3.bf16.msra.mxu1 %v1354_v21 }
  0x47   :  { %1244 = vmatprep.subr.bf16.mxu1 %v1356_v23 }
  0x49   :  { %1223 = vmatpush3.bf16.msra.mxu0 %v1357_v24 }
  0x4a   :  { %1224 = vmatprep.subr.bf16.mxu0 %v1359_v26  ;;  %1245 = vmatpush3.bf16.msra.mxu1 %v1358_v25 }
  0x4b   :  { %1246 = vmatprep.subr.bf16.mxu1 %v1360_v27 }
  0x4d   :  { %1225 = vmatpush3.bf16.msra.mxu0 %v1361_v28 }
  0x4e   :  { %1226 = vmatprep.subr.bf16.mxu0 %v1363_v30  ;;  %1247 = vmatpush3.bf16.msra.mxu1 %v1362_v29 }
  0x4f   :  { %1248 = vmatprep.subr.bf16.mxu1 %v1364_v31 }
  0x51   :  { %1227 = vmatpush3.bf16.msra.mxu0 %v1365_v32 }
  0x52   :  { %1249 = vmatpush3.bf16.msra.mxu1 %v1366_v33  ;;  %1265 = vmatprep.subr.bf16.mxu0 %v1415_v37  ;;  %v1158_v33 = vld [vmem:[%s1560_s2] ss:$0 sm:$0xff] }
  0x54   :  { %870 = vmatmul.mubr.bf16.vlgmr.msra.gmra.mrb[4].mxu0 %v239_v60 }
  0x55   :  { %911 = vmatmul.mubr.bf16.vlgmr.msra.gmra.mrb[4].mxu1 %v241_v62  ;;  %1266 = vmatpush3.bf16.msra.mxu0 %v1379_v63 }
  0x56   :  { %1267 = vmatprep.subr.bf16.mxu0 %v1415_v37  ;;  %1281 = vmatprep.mubr.msk.bf16.mxu0 %vm1416_vm0, %v1415_v37 }
  0x59   :  { %1268 = vmatpush3.bf16.msra.mxu0 %v1380_v0 }
  0x5a   :  { %1269 = vmatprep.subr.bf16.mxu0 %v1415_v37 }
  0x5d   :  { %1270 = vmatpush3.bf16.msra.mxu0 %v1381_v1 }
  0x5e   :  { %1271 = vmatprep.subr.bf16.mxu0 %v1415_v37 }
  0x61   :  { %1272 = vmatpush3.bf16.msra.mxu0 %v1382_v2 }
  0x62   :  { %1273 = vmatprep.subr.bf16.mxu0 %v1415_v37 }
  0x65   :  { %1274 = vmatpush3.bf16.msra.mxu0 %v1383_v3 }
  0x66   :  { %1275 = vmatprep.subr.bf16.mxu0 %v1415_v37 }
  0x69   :  { %1276 = vmatpush3.bf16.msra.mxu0 %v1384_v4 }
  0x6a   :  { %1277 = vmatprep.subr.bf16.mxu0 %v1415_v37 }
  0x6d   :  { %1278 = vmatpush3.bf16.msra.mxu0 %v1385_v5 }
  0x6e   :  { %1279 = vmatprep.subr.bf16.mxu0 %v1415_v37 }
  0x71   :  { %1280 = vmatpush3.bf16.msra.mxu0 %v1386_v6 }
 0x107   :  { %v1184_v7 = vpop.f32.mrb[0].mxu0 }
 0x108   :  { %v1185_v8 = vpop.f32.mrb[1].mxu0  ;;  %v1206_v9 = vpop.f32.mrb[0].mxu1 }
 0x109   :  { %v1186_v10 = vadd.f32 %v1185_v8, %v1184_v7  ;;  %v1187_v11 = vpop.f32.mrb[2].mxu0  ;;  %v1207_v12 = vpop.f32.mrb[1].mxu1 }
 0x10a   :  { %v1188_v13 = vpop.f32.mrb[3].mxu0  ;;  %v1208_v14 = vadd.f32 %v1207_v12, %v1206_v9  ;;  %v1209_v15 = vpop.f32.mrb[2].mxu1 }
 0x10b   :  { %v1189_v16 = vadd.f32 %v1188_v13, %v1187_v11  ;;  %v1210_v17 = vpop.f32.mrb[3].mxu1 }
 0x10c   :  { %v831_v18 = vadd.f32 %v1208_v14, %v1186_v10  ;;  %v1211_v19 = vadd.f32 %v1210_v17, %v1209_v15 }
 0x10e   :  { %v834_v20 = vadd.f32 %v1211_v19, %v1189_v16 }
 0x127   :  { %v1228_v21 = vpop.f32.mrb[4].mxu0 }
 0x128   :  { %v1250_v22 = vpop.f32.mrb[4].mxu1  ;;  %v1229_v23 = vpop.f32.mrb[5].mxu0 }
 0x129   :  { %v1230_v24 = vadd.f32 %v1229_v23, %v1228_v21  ;;  %v1251_v25 = vpop.f32.mrb[5].mxu1  ;;  %v1231_v26 = vpop.f32.mrb[6].mxu0 }
 0x12a   :  { %v1252_v27 = vadd.f32 %v1251_v25, %v1250_v22  ;;  %v1253_v28 = vpop.f32.mrb[6].mxu1  ;;  %v1232_v29 = vpop.f32.mrb[7].mxu0 }
 0x12b   :  { %v872_v30 = vadd.f32 %v1230_v24, %v831_v18  ;;  %v1233_v31 = vadd.f32 %v1232_v29, %v1231_v26  ;;  %v1254_v32 = vpop.f32.mrb[7].mxu1 }
 0x12c   :  { %v1255_v34 = vadd.f32 %v1254_v32, %v1253_v28 }
 0x12d   :  { %v913_v35 = vadd.f32 %v1252_v27, %v872_v30  ;;  %v875_v36 = vadd.f32 %v1233_v31, %v834_v20 }
 0x12f   :  { %v935_v38 = vadd.f32 %v1158_v33, %v913_v35  ;;  %v916_v39 = vadd.f32 %v1255_v34, %v875_v36 }
 0x131   :  { %v936_v40 = vadd.f32 %v1158_v33, %v916_v39  ;;  %v937_v41 = vmax.f32 %v935_v38, 0.0 }
 0x133   :  { %v938_v42 = vmax.f32 %v936_v40, 0.0 }
 0x135   :  { %v939_v43 = vpack.c.bf16 %v938_v42, %v937_v41 }
 0x137   :  { %1282 = vmatmul.mubr.bf16.vlgmr.msra.gmra.mrb[8].mxu0 %v939_v43 }
 0x20a   :  { %v1045_v45 = vpop.f32.mrb[8].mxu0 }
 0x20b   :  { %v1046_v46 = vadd.f32 %v1159_v44, %v1045_v45  ;;  %v1283_v47 = vpop.f32.mrb[9].mxu0 }
 0x20c   :  { %v1048_v48 = vpop.f32.mrb[10].mxu0 }
 0x20d   :  { %1052 = vst [vmem:[#allocation5] sm:$0xff] %v1046_v46  ;;  %v1284_v49 = vpop.f32.mrb[11].mxu0 }
 0x214   :  { %v1071_v50 = vld [vmem:[#allocation5] sm:$0x3] }
 0x215   :  { %1072 = vst [vmem:[%s1563_s5] sm:$0x3] %v1071_v50 }
 0x216   :  { %1089 = vsyncpa [#allocation4], 1 }

</bundles_post_ra>
